<compile_context>
chip_gen: v6e
topology: v6e:2x2x1
jax: 0.10.0
libtpu: 0.0.40
codegen_flags: <defaults>
</compile_context>

<pallas_src>
import jax
import jax.numpy as jnp
from jax.experimental import pallas as pl
from jax.experimental.pallas import tpu as pltpu

IN_FEATURES = 4096
OUT_FEATURES = 150000


def _default_tiling():
    """Pick (tn, vmem_limit_bytes) from the chip's VMEM capacity.

    v5e/v6e (128 MiB VMEM): tn=4096, 96 MiB limit (2 x 32 MiB bf16 weight slabs).
    v7x     ( 64 MiB VMEM): tn=2048, 48 MiB limit (2 x 16 MiB bf16 weight slabs).
    """
    vmem_cap = 64 * 1024 * 1024  # conservative (v7x-sized) default if query fails
    try:
        info = pltpu.get_tpu_info()
        vmem_cap = int(getattr(info, "vmem_capacity_bytes", vmem_cap))
    except Exception:
        pass
    if vmem_cap >= 128 * 1024 * 1024:
        return 4096, 96 * 1024 * 1024
    return 2048, 48 * 1024 * 1024


def linear_kernel(x_ref, w_ref, b_ref, o_ref):
    # One grid step: o[:, j*tn:(j+1)*tn] = x @ W_slab_j + b[:, j*tn:(j+1)*tn].
    # W_slab_j is one contiguous (K, tn) bf16 slab (pre-tiled weight layout);
    # the bias is VMEM-resident and sliced per step. MXU accumulates in f32.
    j = pl.program_id(0)
    tn = w_ref.shape[-1]
    start = pl.multiple_of(j * tn, 128)
    b_tile = b_ref[:, pl.ds(start, tn)]                       # (1, tn) f32
    o_ref[...] = (
        jnp.dot(x_ref[...], w_ref[...], preferred_element_type=jnp.float32)
        + b_tile
    ).astype(o_ref.dtype)


def linear_pallas(x, w_tiled, b, *, vmem_limit_bytes=None):
    """x: (M, K) bf16, w_tiled: (N//tn, K, tn) bf16, b: (1, N) f32 -> (M, N) f32."""
    M, K = x.shape
    n_tiles, Kw, tn = w_tiled.shape
    N = n_tiles * tn
    assert K == Kw and b.shape == (1, N)
    assert tn % 128 == 0

    if vmem_limit_bytes is None:
        _, vmem_limit_bytes = _default_tiling()

    flops = 2 * M * K * N
    bytes_accessed = (
        K * N * w_tiled.dtype.itemsize   # weight stream (dominant term)
        + M * K * x.dtype.itemsize       # x, read once (VMEM-resident)
        + N * b.dtype.itemsize           # bias, read once (VMEM-resident)
        + M * N * 4                      # f32 output
    )

    return pl.pallas_call(
        linear_kernel,
        out_shape=jax.ShapeDtypeStruct((M, N), jnp.float32),
        grid_spec=pltpu.PrefetchScalarGridSpec(
            num_scalar_prefetch=0,
            grid=(n_tiles,),                                       # N tiles only; K fully inside
            in_specs=[
                pl.BlockSpec((M, K), lambda j: (0, 0)),            # x: fully VMEM-resident
                pl.BlockSpec((None, K, tn), lambda j: (j, 0, 0)),  # W: contiguous slab j
                pl.BlockSpec((1, N), lambda j: (0, 0)),            # bias: fully VMEM-resident
            ],
            out_specs=pl.BlockSpec((M, tn), lambda j: (0, j)),
        ),
        compiler_params=pltpu.CompilerParams(
            dimension_semantics=("parallel",),                     # megacore-shard N on v7x
            vmem_limit_bytes=vmem_limit_bytes,
        ),
        cost_estimate=pl.CostEstimate(
            flops=flops, transcendentals=0, bytes_accessed=bytes_accessed
        ),
    )(x, w_tiled, b)


def toy_model_forward(x, w_tiled, b, out_features=OUT_FEATURES):
    """ToyModel.forward: o = Linear(in, out)(x) == x @ W^T + b.

    x is cast to bf16 (intentional precision choice: halves the only large
    operand and matches bf16 weight storage); accumulation stays f32.
    """
    o_padded = linear_pallas(x.astype(jnp.bfloat16), w_tiled, b)
    # TODO(synk): the original forward()'s `print('39 net', ...)` is a host-side
    # debug print with no compute; intentionally omitted from the kernel.
    return o_padded[:, :out_features]


def make_params(key, in_features=IN_FEATURES, out_features=OUT_FEATURES, *, tn=None):
    """Deterministic synthetic init of the Linear params in the pre-tiled layout.

    Returns:
      w_tiled: (n_tiles, in_features, tn) bf16 -- contiguous per-grid-step slabs
               of the transposed weight; slab t covers output features
               [t*tn, (t+1)*tn).
      b:       (1, n_tiles * tn) f32 bias.
    out_features is padded up to a multiple of 2*tn (even tile count -> equal
    halves per v7x TensorCore); padded columns are zeroed.
    """
    if tn is None:
        tn, _ = _default_tiling()
    step = 2 * tn
    n_pad = ((out_features + step - 1) // step) * step
    n_tiles = n_pad // tn

    kw, kb = jax.random.split(key)
    bound = 1.0 / jnp.sqrt(jnp.float32(in_features))
    w = jax.random.uniform(
        kw, (n_tiles, in_features, tn), dtype=jnp.bfloat16, minval=-bound, maxval=bound
    )
    b = jax.random.uniform(
        kb, (1, n_pad), dtype=jnp.float32, minval=-bound, maxval=bound
    )
    # Zero the padded output columns (keeps padded output harmless).
    col = (
        jnp.arange(n_tiles, dtype=jnp.int32)[:, None, None] * tn
        + jnp.arange(tn, dtype=jnp.int32)[None, None, :]
    )
    w = jnp.where(col < out_features, w, jnp.array(0, w.dtype))
    b = jnp.where(jnp.arange(n_pad)[None, :] < out_features, b, 0.0)
    return w, b


if __name__ == "__main__":
    key = jax.random.PRNGKey(0)
    kx, kp = jax.random.split(key)

    # Small shapes (same forward semantics as Linear(4096, 150000), scaled down
    # so the sandbox never materializes a multi-GB weight).
    batch, in_features, out_features, tn = 2, 512, 1000, 256

    x = jax.random.normal(kx, (batch, in_features), dtype=jnp.float32)
    w_tiled, b = make_params(kp, in_features, out_features, tn=tn)

    o = toy_model_forward(x, w_tiled, b, out_features)
    o = jax.block_until_ready(o)
    assert o.shape == (batch, out_features) and o.dtype == jnp.float32

    # Correctness check against plain XLA matmul on the same bf16-rounded values.
    n_tiles, _, tn_w = w_tiled.shape
    w_full = jnp.transpose(w_tiled, (1, 0, 2)).reshape(in_features, n_tiles * tn_w)
    ref = (
        jnp.dot(x.astype(jnp.bfloat16).astype(jnp.float32), w_full.astype(jnp.float32))
        + b
    )[:, :out_features]
    assert jnp.allclose(o, ref, atol=2e-2, rtol=2e-2)

    print("KERNEL_OK")
</pallas_src>

<mosaic_0001>
module attributes {stable_mosaic.version = 11 : i64} {
  func.func @linear_kernel(%arg0: i32, %arg1: memref<2x512xbf16, #tpu.memory_space<vmem>>, %arg2: memref<1x512x256xbf16, #tpu.memory_space<vmem>>, %arg3: memref<1x1024xf32, #tpu.memory_space<vmem>>, %arg4: memref<2x256xf32, #tpu.memory_space<vmem>>) attributes {dimension_semantics = [#tpu.dimension_semantics<parallel>], iteration_bounds = array<i64: 4>, scalar_prefetch = 0 : i64, scratch_operands = 0 : i64, tpu.core_type = #tpu.core_type<tc>, window_params = [{pipeline_mode = #tpu.pipeline_mode<synchronous>, transform_indices = @transform_0, window_bounds = array<i64: 2, 512>}, {transform_indices = @transform_1, window_bounds = array<i64: 1, 512, 256>}, {pipeline_mode = #tpu.pipeline_mode<synchronous>, transform_indices = @transform_2, window_bounds = array<i64: 1, 1024>}, {transform_indices = @transform_3, window_bounds = array<i64: 2, 256>}]} {
    %c256_i32 = arith.constant 256 : i32
    %0 = arith.muli %arg0, %c256_i32 : i32
    %1 = tpu.assume_multiple %0, 128 : i32
    %c0 = arith.constant 0 : index
    %2 = arith.index_cast %1 : i32 to index
    %3 = vector.load %arg3[%c0, %2] : memref<1x1024xf32, #tpu.memory_space<vmem>>, vector<1x256xf32>
    %c0_0 = arith.constant 0 : index
    %c0_1 = arith.constant 0 : index
    %4 = vector.load %arg1[%c0_0, %c0_1] : memref<2x512xbf16, #tpu.memory_space<vmem>>, vector<2x512xbf16>
    %c0_2 = arith.constant 0 : index
    %c0_3 = arith.constant 0 : index
    %c0_4 = arith.constant 0 : index
    %5 = vector.load %arg2[%c0_2, %c0_3, %c0_4] : memref<1x512x256xbf16, #tpu.memory_space<vmem>>, vector<1x512x256xbf16>
    %6 = vector.shape_cast %5 : vector<1x512x256xbf16> to vector<512x256xbf16>
    %cst = arith.constant dense<0.000000e+00> : vector<2x256xf32>
    %7 = tpu.matmul %4, %6, %cst {dimension_numbers = #tpu.dot_dimension_numbers<[1], [0], [0], [1], [0, 0, 1, 1], [], []>} : vector<2x512xbf16>, vector<512x256xbf16>, vector<2x256xf32> -> vector<2x256xf32>
    %8 = vector.broadcast %3 : vector<1x256xf32> to vector<2x256xf32>
    %9 = arith.addf %7, %8 : vector<2x256xf32>
    %c0_5 = arith.constant 0 : index
    %c0_6 = arith.constant 0 : index
    %10 = vector.load %arg4[%c0_5, %c0_6] : memref<2x256xf32, #tpu.memory_space<vmem>>, vector<2x256xf32>
    tpu.vector_store %arg4[%c0_5, %c0_6], %9 {strides = array<i32>} : memref<2x256xf32, #tpu.memory_space<vmem>>, vector<2x256xf32>,
    return
  }
  func.func @transform_0(%arg0: i32) -> (i32, i32) {
    %c0_i32 = arith.constant 0 : i32
    %c0_i32_0 = arith.constant 0 : i32
    %c0_i32_1 = arith.constant 0 : i32
    return %c0_i32, %c0_i32_0 : i32, i32
  }
  func.func @transform_1(%arg0: i32) -> (i32, i32, i32) {
    %c0_i32 = arith.constant 0 : i32
    %c0_i32_0 = arith.constant 0 : i32
    %c0_i32_1 = arith.constant 0 : i32
    return %arg0, %c0_i32, %c0_i32_0 : i32, i32, i32
  }
  func.func @transform_2(%arg0: i32) -> (i32, i32) {
    %c0_i32 = arith.constant 0 : i32
    %c0_i32_0 = arith.constant 0 : i32
    %c0_i32_1 = arith.constant 0 : i32
    return %c0_i32, %c0_i32_0 : i32, i32
  }
  func.func @transform_3(%arg0: i32) -> (i32, i32) {
    %c0_i32 = arith.constant 0 : i32
    %c0_i32_0 = arith.constant 0 : i32
    return %c0_i32, %arg0 : i32, i32
  }
}

</mosaic_0001>

<bundles_post_ra>
// kernel: tpu_custom_call.1
= control target key start
LH: loop header
LB: loop body
LE: loop exit
PB: predicated region body
PF: predicated region fallthrough
CT: control target
= control target key end

     0   :  { %8 = vsyncpa [#allocation3], 0  ;;  %s1534_s0 = inlined_call_operand.hbm [shape: bf16[2,512], index: 0, kind: input, shape index: {}]   ;;  %s1535_s1 = inlined_call_operand.hbm [shape: bf16[4,512,256], index: 1, kind: input, shape index: {}]   ;;  %s1536_s2 = inlined_call_operand.hbm [shape: f32[1,1024], index: 2, kind: input, shape index: {}]   ;;  %s1537_s3 = inlined_call_operand.hbm [shape: f32[2,1024], index: 3, kind: output, shape index: {}]  }
   0x1   :  { %9 = vsyncpa [#allocation6], 0 }
   0x2   :  { %11 = vsyncpa [#allocation6 + $0x1], 0 }
   0x3   :  { %12 = vsyncpa [#allocation4], 0 }
   0x4   :  { %14 = vsyncpa [#allocation4 + $0x1], 0  ;;  %s1280_s12 = smov 0   ;;  %s1282_s13 = smov 0  }
   0x5   :  { %s1284_s14 = smov 0   ;;  %s1286_s15 = smov 0  }
   0x6 LB: > { %s1301_s16 = sadd.s32 4294967295, %s1251_s15   ;;  %s846_s17 = sadd.s32 4294967294, %s1251_s15   ;;  %s1251_s15 = sphi %s1286_s15, %s1560_s15   ;;  %s1247_s14 = sphi %s1284_s14, %s1559_s14   ;;  %s1243_s13 = sphi %s1282_s13, %s1558_s13   ;;  %s1239_s12 = sphi %s1280_s12, %s1557_s12  }
   0x7   : > { %s1305_s18 = sadd.s32 1, %s1251_s15   ;;  %s48_s19 = sadd.s32 1, %s1247_s14 }
   0x8   : > { %s45_s20 = ssub.s32 %s1251_s15, %s1305_s18  ;;  %p55_p0 = scmp.ne.s32.totalorder %s1247_s14, %s1243_s13 }
   0x9   : > { %p46_p1 = scmp.eq.s32.totalorder %s45_s20, 0  ;;  %p56_p2 = scmp.eq.s32.totalorder %s1251_s15, 0 }
   0xa   : > { %p61_p3 = scmp.ne.s32.totalorder %s1243_s13, %s1239_s12  ;;  %p1538_p4 = scmp.eq.s32.totalorder %s1301_s16, 0 }
   0xb   : > { %s1317_s21 = scalar_select %p46_p1, %s1247_s14, %s48_s19  }
   0xc   : > { %p1319_p5 = por %p56_p2, %p55_p0  ;;  %p1325_p6 = por %p1538_p4, %p61_p3 }
   0xd   : > { %p106_p7 = scmp.eq.s32.totalorder %s1301_s16, 3  ;;  %p112_p8 = scmp.eq.s32.totalorder %s846_s17, 3 }
   0xe   : > { %s1543_s23 = scalar_select %p1325_p6, 1, 0 }
   0xf   : > { %p847_p9 = scmp.ge.s32.totalorder %s1251_s15, 1  ;;  %p119_p10 = scmp.lt.s32.totalorder %s1251_s15, 5 }
  0x10   : > { %p1332_p11 = por %p106_p7, %p55_p0  ;;  %p1336_p12 = por %p112_p8, %p61_p3 }
  0x11   : > { %p1340_p13 = pnand %p847_p9, %p119_p10  ;;  %s1253_s27 = smov [#allocation7]  }
  0x12   : > { %s1544_s24 = scalar_select %p1332_p11, 1, 0 }
  0x13   : > { %s1545_s25 = scalar_select %p1336_p12, 1, 0 }
  0x14   : > { %s1546_s26 = scalar_select %p1340_p13, 1, 0 }
  0x15   : > { %p945_p1 = pneg %p1340_p13  ;;  %s143_s28 = sshll.u32 %s1253_s27, 4  ;;  %s144_s28 = int_to_ptr.vmem [resolvable:$true] %s143_s28 }
  0x16   : > { %p962_p2 = scmp.lt.s32.totalorder %s1251_s15, 4  ;;  %s1254_s4 = smov [#allocation2]  }
  0x17   : > { %p1349_p0 = pnand %p945_p1, %p1538_p4  ;;  %s132_s5 = sshll.u32 %s1254_s4, 4  ;;  %s133_s5 = int_to_ptr.vmem [resolvable:$true] %s132_s5 }
  0x18   : > { %p1355_p3 = pnand %p962_p2, %p1319_p5  ;;  %s1110_s6 = scalar_lea.vmem %s144_s28, 128 }
  0x19   : > { %p1101_p7 = pneg %p1349_p0  ;;  %p1111_p8 = scmp.ne.s32.totalorder %s144_s28, %s1110_s6 }
  0x1a   : > { %p1118_p1 = scmp.lt.s32.totalorder %s144_s28, %s144_s28  ;;  %p1119_p4 = scmp.lt.s32.totalorder %s1110_s6, %s1110_s6 }
  0x1b   : > { %p1113_p9 = pnand %p1111_p8, %p1101_p7 }
  0x1c   : > { %p1120_p12 = por %p1119_p4, %p1118_p1 }
  0x1d   : > { %p1114_p10 = pneg %p1113_p9 }
  0x1f   : > { %p1121_p11 = pnand %p1120_p12, %p1114_p10 }
  0x21   : > { %1124 = shalt.err (!%p1121_p11)
}
  0x22   : > { %951 = dma.hbm_to_vmem [thread:$0]  (!%p1349_p0), %s1536_s2, 128, %s144_s28, [#allocation6]  }
  0x23   : > { %s154_s9 = sand.u32 1, %s1251_s15   ;;  %s1136_s10 = scalar_lea.vmem %s133_s5, 64 }
  0x24   : > { %p1137_p5 = scmp.ne.s32.totalorder %s133_s5, %s1136_s10  ;;  %p1144_p9 = scmp.lt.s32.totalorder %s133_s5, %s133_s5 }
  0x25   : > { %p1145_p6 = scmp.lt.s32.totalorder %s1136_s10, %s1136_s10 }
  0x26   : > { %p1139_p2 = pnand %p1137_p5, %p1101_p7 }
  0x27   : > { %p1146_p4 = por %p1145_p6, %p1144_p9 }
  0x28   : > { %p1140_p8 = pneg %p1139_p2 }
  0x2a   : > { %p1147_p12 = pnand %p1146_p4, %p1140_p8 }
  0x2c   : > { %1150 = shalt.err (!%p1147_p12)
}
  0x2d   : > { %948 = dma.hbm_to_vmem [thread:$0]  (!%p1349_p0), %s1534_s0, 64, %s133_s5, [#allocation3]  }
  0x2e   : > { %s156_s19 = sand.u32 1, %s1247_s14   ;;  %s931_s22 = sshll.u32 %s1251_s15, 13 }
  0x2f   : > { %s851_s20 = sshll.u32 %s156_s19, 9  ;;  %s1383_s4 = scalar_lea.hbm %s1535_s1, %s931_s22 }
  0x30   : > { %s158_s6 = scalar_lea.vmem [#allocation5], %s851_s20  ;;  %s1387_s7 = scalar_lea.sflag [#allocation6], %s154_s9 }
  0x31   : > { %s165_s29 = sshll.u32 %s158_s6, 4  ;;  %s1151_s8 = scalar_lea.hbm %s1383_s4, 8192  ;;  %s1385_s29 = int_to_ptr.vmem [resolvable:$true] %s165_s29 }
  0x32   : > { %p1152_p6 = scmp.ne.s32.totalorder %s1383_s4, %s1151_s8  ;;  %p1153_p11 = pneg %p1355_p3 }
  0x33   : > { %s1156_s11 = scalar_lea.hbm %s1535_s1, 32768  ;;  %p1157_p10 = scmp.lt.s32.totalorder %s1383_s4, %s1535_s1 }
  0x34   : > { %p1154_p0 = pnand %p1153_p11, %p1152_p6  ;;  %p1158_p1 = scmp.lt.s32.totalorder %s1156_s11, %s1151_s8 }
  0x36   : > { %p1155_p7 = pneg %p1154_p0  ;;  %p1159_p5 = por %p1158_p1, %p1157_p10 }
  0x38   : > { %p1160_p2 = pnand %p1159_p5, %p1155_p7 }
  0x3a   : > { %1163 = shalt.err (!%p1160_p2)
}
  0x3b   : > { %s1164_s9 = scalar_lea.vmem %s1385_s29, 8192  ;;  %s1255_s20 = smov [#allocation5]  }
  0x3c   : > { %p1165_p8 = scmp.ne.s32.totalorder %s1385_s29, %s1164_s9  ;;  %s1169_s22 = sshll.u32 %s1255_s20, 4  ;;  %s1170_s22 = int_to_ptr.vmem [resolvable:$false] %s1169_s22 }
  0x3d   : > { %s1171_s27 = scalar_lea.vmem %s1170_s22, 16384  ;;  %p1172_p12 = scmp.lt.s32.totalorder %s1385_s29, %s1170_s22 }
  0x3e   : > { %p1167_p9 = pnand %p1165_p8, %p1153_p11  ;;  %p1173_p6 = scmp.lt.s32.totalorder %s1171_s27, %s1164_s9 }
  0x40   : > { %p1168_p4 = pneg %p1167_p9  ;;  %p1174_p0 = por %p1173_p6, %p1172_p12 }
  0x42   : > { %p1175_p13 = pnand %p1174_p0, %p1168_p4 }
  0x44   : > { %1178 = shalt.err (!%p1175_p13)
}
  0x45   : > { %s1256_s28 = smov 128   ;;  %s1257_s6 = smov 8  }
  0x46   : > { %955 = dma.hbm_to_vmem [thread:$0]  (!%p1355_p3), %s1383_s4, 8192, %s1385_s29, %s1387_s7, %s1256_s28, %s1256_s28, %s1257_s6  }
  0x47   : > { %p1549_p11 = scmp.ne.s32.totalorder %s1546_s26, 0 }
  0x48   : > { %p1550_p7 = scmp.eq.s32.totalorder (!%p1549_p11), %s1301_s16, 0 }
  0x49   : > { %177 = sbr.rel (%p1549_p11) target bundleno = 366 (0x16e), region = 32 }
  0x4e   : > { %1222 = dma.done.wait (%p1550_p7), [#allocation3], 64   ;;  %p1551_p10 = pmov %p1550_p7 }
  0x4f   : > { %s183_s8 = sand.u32 1, %s1301_s16   ;;  %s1416_s5 = sand.u32 1, %s1243_s13  }
  0x50   : > { %1224 = vsyncadd (%p1551_p10), [#allocation3], 4294967232  ;;  %s856_s10 = sshll.u32 %s1416_s5, 9  ;;  %s184_s11 = scalar_lea.sflag [#allocation6], %s183_s8 }
  0x51   : > { %s1419_s30 = scalar_lea.vmem [#allocation5], %s856_s10  ;;  %p1552_p13 = scmp.ne.s32.totalorder %s1543_s23, 0 }
  0x53   : > { %1226 = dma.done.wait (%p1552_p13), %s184_s11, 8192  }
  0x54   : > { %1228 = vsyncadd (%p1552_p13), %s184_s11, 4294959104  ;;  %p1553_p3 = pmov %p1550_p7 }
  0x56   : > { %1230 = dma.done.wait (%p1553_p3), [#allocation6], 128   ;;  %p1554_p1 = pmov %p1553_p3 }
  0x57   : > { %v1003_v0 = vld [vmem:[%s1419_s30 + $0x74] ss:$8 sps:$4 sm:$0xff]   ;;  %v1007_v2 = vld [vmem:[%s1419_s30 + $0x70] ss:$8 sps:$4 sm:$0xff]   ;;  %v1009_v4 = vld [vmem:[%s1419_s30 + $0x64] ss:$8 sps:$4 sm:$0xff]   ;;  %v286_v38 = vlaneseq }
  0x58   : > { %1232 = vsyncadd (%p1554_p1), [#allocation6], 4294967168  ;;  %v1005_v1 = vld [vmem:[%s1419_s30 + $0x174] ss:$8 sps:$4 sm:$0xff]   ;;  %645 = vmatprep.subr.bf16.mxu0 %v1003_v0  ;;  %v1008_v3 = vld [vmem:[%s1419_s30 + $0x170] ss:$8 sps:$4 sm:$0xff]  }
  0x59   : > { %686 = vmatprep.subr.bf16.mxu1 %v1005_v1  ;;  %646 = vmatpush1.bf16.msra.mxu0 %v1007_v2  ;;  %v1011_v5 = vld [vmem:[%s1419_s30 + $0x164] ss:$8 sps:$4 sm:$0xff]   ;;  %v1013_v6 = vld [vmem:[%s1419_s30 + $0x60] ss:$8 sps:$4 sm:$0xff]   ;;  %v1015_v8 = vld [vmem:[%s1419_s30 + $0x54] ss:$8 sps:$4 sm:$0xff]  }
  0x5a   : > { %687 = vmatpush1.bf16.msra.mxu1 %v1008_v3  ;;  %647 = vmatprep.subr.bf16.mxu0 %v1009_v4  ;;  %v1014_v7 = vld [vmem:[%s1419_s30 + $0x160] ss:$8 sps:$4 sm:$0xff]   ;;  %v1017_v9 = vld [vmem:[%s1419_s30 + $0x154] ss:$8 sps:$4 sm:$0xff]   ;;  %v1019_v10 = vld [vmem:[%s1419_s30 + $0x50] ss:$8 sps:$4 sm:$0xff]  }
  0x5b   : > { %688 = vmatprep.subr.bf16.mxu1 %v1011_v5  ;;  %v1020_v11 = vld [vmem:[%s1419_s30 + $0x150] ss:$8 sps:$4 sm:$0xff]   ;;  %v1021_v12 = vld [vmem:[%s1419_s30 + $0x44] ss:$8 sps:$4 sm:$0xff]   ;;  %v1025_v14 = vld [vmem:[%s1419_s30 + $0x40] ss:$8 sps:$4 sm:$0xff]  }
  0x5c   : > { %v1023_v13 = vld [vmem:[%s1419_s30 + $0x144] ss:$8 sps:$4 sm:$0xff]   ;;  %v1026_v15 = vld [vmem:[%s1419_s30 + $0x140] ss:$8 sps:$4 sm:$0xff]   ;;  %v1027_v16 = vld [vmem:[%s1419_s30 + $0x34] ss:$8 sps:$4 sm:$0xff]  }
  0x5d   : > { %648 = vmatpush1.bf16.msra.mxu0 %v1013_v6  ;;  %v1029_v17 = vld [vmem:[%s1419_s30 + $0x134] ss:$8 sps:$4 sm:$0xff]   ;;  %v1031_v18 = vld [vmem:[%s1419_s30 + $0x30] ss:$8 sps:$4 sm:$0xff]   ;;  %v1033_v20 = vld [vmem:[%s1419_s30 + $0x24] ss:$8 sps:$4 sm:$0xff]  }
  0x5e   : > { %689 = vmatpush1.bf16.msra.mxu1 %v1014_v7  ;;  %649 = vmatprep.subr.bf16.mxu0 %v1015_v8  ;;  %v1032_v19 = vld [vmem:[%s1419_s30 + $0x130] ss:$8 sps:$4 sm:$0xff]   ;;  %v1035_v21 = vld [vmem:[%s1419_s30 + $0x124] ss:$8 sps:$4 sm:$0xff]   ;;  %v1037_v22 = vld [vmem:[%s1419_s30 + $0x20] ss:$8 sps:$4 sm:$0xff]  }
  0x5f   : > { %690 = vmatprep.subr.bf16.mxu1 %v1017_v9  ;;  %v1038_v23 = vld [vmem:[%s1419_s30 + $0x120] ss:$8 sps:$4 sm:$0xff]   ;;  %v1039_v24 = vld [vmem:[%s1419_s30 + $0x14] ss:$8 sps:$4 sm:$0xff]   ;;  %v1043_v26 = vld [vmem:[%s1419_s30 + $0x10] ss:$8 sps:$4 sm:$0xff]  }
  0x60   : > { %v1041_v25 = vld [vmem:[%s1419_s30 + $0x114] ss:$8 sps:$4 sm:$0xff]   ;;  %v1044_v27 = vld [vmem:[%s1419_s30 + $0x110] ss:$8 sps:$4 sm:$0xff]   ;;  %v1045_v28 = vld [vmem:[%s1419_s30 + $0x4] ss:$8 sps:$4 sm:$0xff]  }
  0x61   : > { %650 = vmatpush1.bf16.msra.mxu0 %v1019_v10  ;;  %v1047_v29 = vld [vmem:[%s1419_s30 + $0x104] ss:$8 sps:$4 sm:$0xff]   ;;  %v1049_v30 = vld [vmem:[%s1419_s30] ss:$8 sps:$4 sm:$0xff]   ;;  %v1051_v32 = vld [vmem:[%s1419_s30 + $0xf4] ss:$8 sps:$4 sm:$0xff]  }
  0x62   : > { %691 = vmatpush1.bf16.msra.mxu1 %v1020_v11  ;;  %651 = vmatprep.subr.bf16.mxu0 %v1021_v12  ;;  %v1050_v31 = vld [vmem:[%s1419_s30 + $0x100] ss:$8 sps:$4 sm:$0xff]   ;;  %v1053_v33 = vld [vmem:[%s1419_s30 + $0x1f4] ss:$8 sps:$4 sm:$0xff]   ;;  %v1055_v34 = vld [vmem:[%s1419_s30 + $0xf0] ss:$8 sps:$4 sm:$0xff]  }
  0x63   : > { %692 = vmatprep.subr.bf16.mxu1 %v1023_v13  ;;  %v1056_v35 = vld [vmem:[%s1419_s30 + $0x1f0] ss:$8 sps:$4 sm:$0xff]   ;;  %v1057_v36 = vld [vmem:[%s1419_s30 + $0xe4] ss:$8 sps:$4 sm:$0xff]   ;;  %v1258_v39 = vmov 1966171168  }
  0x64   : > { %v1059_v37 = vld [vmem:[%s1419_s30 + $0x1e4] ss:$8 sps:$4 sm:$0xff]   ;;  %v306_v40 = vunpack.c.l.s4 %v1258_v39  ;;  %v1061_v41 = vld [vmem:[%s1419_s30 + $0xe0] ss:$8 sps:$4 sm:$0xff]   ;;  %v1063_v43 = vld [vmem:[%s1419_s30 + $0xd4] ss:$8 sps:$4 sm:$0xff]  }
  0x65   : > { %652 = vmatpush1.bf16.msra.mxu0 %v1025_v14  ;;  %v1062_v42 = vld [vmem:[%s1419_s30 + $0x1e0] ss:$8 sps:$4 sm:$0xff]   ;;  %v1065_v44 = vld [vmem:[%s1419_s30 + $0x1d4] ss:$8 sps:$4 sm:$0xff]   ;;  %v1471_v45 = vshrl.u32 %v286_v38, 7  ;;  %s859_s23 = sshll.u32 %s1301_s16, 8 }
  0x66   : > { %693 = vmatpush1.bf16.msra.mxu1 %v1026_v15  ;;  %653 = vmatprep.subr.bf16.mxu0 %v1027_v16  ;;  %v307_v46 = vunpack.c.0.s8 %v306_v40  ;;  %v1067_v47 = vld [vmem:[%s1419_s30 + $0xd0] ss:$8 sps:$4 sm:$0xff]   ;;  %v1069_v49 = vld [vmem:[%s1419_s30 + $0xc4] ss:$8 sps:$4 sm:$0xff]   ;;  %v1073_v53 = vld [vmem:[%s1419_s30 + $0xc0] ss:$8 sps:$4 sm:$0xff]  }
  0x67   : > { %694 = vmatprep.subr.bf16.mxu1 %v1029_v17  ;;  %v1068_v48 = vld [vmem:[%s1419_s30 + $0x1d0] ss:$8 sps:$4 sm:$0xff]   ;;  %v1071_v50 = vld [vmem:[%s1419_s30 + $0x1c4] ss:$8 sps:$4 sm:$0xff]   ;;  %v1074_v54 = vld [vmem:[%s1419_s30 + $0x1c0] ss:$8 sps:$4 sm:$0xff]  }
  0x68   : > { %v310_v51 = vsub.s32 %v307_v46, %v1471_v45  ;;  %v860_v52 = vld.sshfl [vmem:[#allocation2] sm:$0x33 pattern:$0x75316420]  ;;  %v1079_v59 = vld [vmem:[%s1419_s30 + $0xb0] ss:$8 sps:$4 sm:$0xff]  }
  0x69   : > { %654 = vmatpush1.bf16.msra.mxu0 %v1031_v18  ;;  %v304_v55 = vcombine.high %v860_v52, %v860_v52  ;;  %v1075_v56 = vld [vmem:[%s1419_s30 + $0xb4] ss:$8 sps:$4 sm:$0xff]   ;;  %v1080_v60 = vld [vmem:[%s1419_s30 + $0x1b0] ss:$8 sps:$4 sm:$0xff]   ;;  %v1081_v62 = vld [vmem:[%s1419_s30 + $0xa4] ss:$8 sps:$4 sm:$0xff]  }
  0x6a   : > { %695 = vmatpush1.bf16.msra.mxu1 %v1032_v19  ;;  %655 = vmatprep.subr.bf16.mxu0 %v1033_v20  ;;  %v1077_v57 = vld [vmem:[%s1419_s30 + $0x1b4] ss:$8 sps:$4 sm:$0xff]   ;;  %v1083_v63 = vld [vmem:[%s1419_s30 + $0x1a4] ss:$8 sps:$4 sm:$0xff]   ;;  %v1085_v0 = vld [vmem:[%s1419_s30 + $0xa0] ss:$8 sps:$4 sm:$0xff]   ;;  %v311_v8 = vrot.slane %v860_v52, %v310_v51 }
  0x6b   : > { %696 = vmatprep.subr.bf16.mxu1 %v1035_v21  ;;  %v318_v58 = vrot.slane %v304_v55, %v310_v51  ;;  %v1086_v1 = vld [vmem:[%s1419_s30 + $0x1a0] ss:$8 sps:$4 sm:$0xff]   ;;  %v1087_v2 = vld [vmem:[%s1419_s30 + $0x94] ss:$8 sps:$4 sm:$0xff]   ;;  %v1091_v4 = vld [vmem:[%s1419_s30 + $0x90] ss:$8 sps:$4 sm:$0xff]  }
  0x6c   : > { %v1089_v3 = vld [vmem:[%s1419_s30 + $0x194] ss:$8 sps:$4 sm:$0xff]   ;;  %v1092_v5 = vld [vmem:[%s1419_s30 + $0x190] ss:$8 sps:$4 sm:$0xff]   ;;  %v1093_v6 = vld [vmem:[%s1419_s30 + $0x84] ss:$8 sps:$4 sm:$0xff]   ;;  %v319_v11 = vcombine.high %v311_v8, %v311_v8 }
  0x6d   : > { %656 = vmatpush1.bf16.msra.mxu0 %v1037_v22  ;;  %v320_v61 = vcombine.high %v318_v58, %v318_v58  ;;  %677 = vmatprep.mubr.bf16.mxu0 %v318_v58  ;;  %v1095_v7 = vld [vmem:[%s1419_s30 + $0x184] ss:$8 sps:$4 sm:$0xff]   ;;  %v1097_v9 = vld [vmem:[%s1419_s30 + $0x80] ss:$8 sps:$4 sm:$0xff]   ;;  %s216_s26 = sshra.s32 %s859_s23, 7  ;;  %v288_v12 = vsub.s32 0, %v1471_v45 }
  0x6e   : > { %697 = vmatpush1.bf16.msra.mxu1 %v1038_v23  ;;  %657 = vmatprep.subr.bf16.mxu0 %v1039_v24  ;;  %v1098_v10 = vld [vmem:[%s1419_s30 + $0x180] ss:$8 sps:$4 sm:$0xff]   ;;  %s218_s4 = scalar_lea.vmem [#allocation7], %s216_s26  ;;  %v292_v14 = vsub.s32 1, %v1471_v45  ;;  %s858_s29 = sshll.u32 %s1416_s5, 2 }
  0x6f   : > { %698 = vmatprep.subr.bf16.mxu1 %v1041_v25  ;;  %718 = vmatprep.mubr.bf16.mxu1 %v320_v61  ;;  %v219_v13 = vld [vmem:[%s218_s4] sm:$0x3]  ;;  %s932_s7 = sshll.u32 %s1301_s16, 6  ;;  %s213_s17 = scalar_lea.vmem [#allocation8], %s858_s29 }
  0x70   : > { %v289_v15 = vrot.slane %v219_v13, %v288_v12  ;;  %v293_v16 = vrot.slane %v219_v13, %v292_v14  ;;  %s754_s19 = sshll.u32 %s213_s17, 4  ;;  %s752_s22 = scalar_lea.hbm %s1537_s3, %s932_s7  ;;  %s755_s19 = int_to_ptr.vmem [resolvable:$true] %s754_s19 }
  0x71   : > { %658 = vmatpush1.bf16.msra.mxu0 %v1043_v26  ;;  %s740_s27 = scalar_lea.sflag [#allocation4], %s1416_s5  ;;  %s1179_s28 = scalar_lea.vmem %s755_s19, 64 }
  0x72   : > { %699 = vmatpush1.bf16.msra.mxu1 %v1044_v27  ;;  %659 = vmatprep.subr.bf16.mxu0 %v1045_v28  ;;  %p1180_p5 = scmp.ne.s32.totalorder %s755_s19, %s1179_s28  ;;  %p1555_p2 = scmp.ne.s32.totalorder %s1544_s24, 0 }
  0x73   : > { %700 = vmatprep.subr.bf16.mxu1 %v1047_v29  ;;  %s1259_s16 = smov [#allocation8]  }
  0x74   : > { %p1181_p8 = pnand %p1180_p5, %p1555_p2  ;;  %s1183_s6 = sshll.u32 %s1259_s16, 4  ;;  %s1184_s6 = int_to_ptr.vmem [resolvable:$false] %s1183_s6 }
  0x75   : > { %660 = vmatpush1.bf16.msra.mxu0 %v1049_v30  ;;  %s1185_s8 = scalar_lea.vmem %s1184_s6, 128  ;;  %p1186_p4 = scmp.lt.s32.totalorder %s755_s19, %s1184_s6 }
  0x76   : > { %701 = vmatpush1.bf16.msra.mxu1 %v1050_v31  ;;  %661 = vmatprep.subr.bf16.mxu0 %v1051_v32  ;;  %p1182_p9 = pneg %p1181_p8  ;;  %p1187_p12 = scmp.lt.s32.totalorder %s1185_s8, %s1179_s28 }
  0x77   : > { %702 = vmatprep.subr.bf16.mxu1 %v1053_v33 }
  0x78   : > { %p1188_p6 = por %p1187_p12, %p1186_p4 }
  0x79   : > { %662 = vmatpush2.bf16.msra.mxu0 %v1055_v34 }
  0x7a   : > { %703 = vmatpush2.bf16.msra.mxu1 %v1056_v35  ;;  %663 = vmatprep.subr.bf16.mxu0 %v1057_v36  ;;  %p1189_p0 = pnand %p1188_p6, %p1182_p9 }
  0x7b   : > { %704 = vmatprep.subr.bf16.mxu1 %v1059_v37 }
  0x7d   : > { %664 = vmatpush2.bf16.msra.mxu0 %v1061_v41 }
  0x7e   : > { %705 = vmatpush2.bf16.msra.mxu1 %v1062_v42  ;;  %665 = vmatprep.subr.bf16.mxu0 %v1063_v43 }
  0x7f   : > { %706 = vmatprep.subr.bf16.mxu1 %v1065_v44 }
  0x81   : > { %666 = vmatpush2.bf16.msra.mxu0 %v1067_v47 }
  0x82   : > { %707 = vmatpush2.bf16.msra.mxu1 %v1068_v48  ;;  %667 = vmatprep.subr.bf16.mxu0 %v1069_v49 }
  0x83   : > { %708 = vmatprep.subr.bf16.mxu1 %v1071_v50 }
  0x85   : > { %668 = vmatpush2.bf16.msra.mxu0 %v1073_v53 }
  0x86   : > { %709 = vmatpush2.bf16.msra.mxu1 %v1074_v54  ;;  %669 = vmatprep.subr.bf16.mxu0 %v1075_v56 }
  0x87   : > { %710 = vmatprep.subr.bf16.mxu1 %v1077_v57 }
  0x89   : > { %670 = vmatpush2.bf16.msra.mxu0 %v1079_v59 }
  0x8a   : > { %711 = vmatpush2.bf16.msra.mxu1 %v1080_v60  ;;  %671 = vmatprep.subr.bf16.mxu0 %v1081_v62 }
  0x8b   : > { %712 = vmatprep.subr.bf16.mxu1 %v1083_v63 }
  0x8d   : > { %672 = vmatpush2.bf16.msra.mxu0 %v1085_v0 }
  0x8e   : > { %713 = vmatpush2.bf16.msra.mxu1 %v1086_v1  ;;  %673 = vmatprep.subr.bf16.mxu0 %v1087_v2 }
  0x8f   : > { %714 = vmatprep.subr.bf16.mxu1 %v1089_v3 }
  0x91   : > { %674 = vmatpush2.bf16.msra.mxu0 %v1091_v4 }
  0x92   : > { %715 = vmatpush2.bf16.msra.mxu1 %v1092_v5  ;;  %675 = vmatprep.subr.bf16.mxu0 %v1093_v6 }
  0x93   : > { %716 = vmatprep.subr.bf16.mxu1 %v1095_v7 }
  0x95   : > { %676 = vmatpush2.bf16.msra.mxu0 %v1097_v9 }
  0x96   : > { %717 = vmatpush2.bf16.msra.mxu1 %v1098_v10 }
  0x98   : > { %678 = vmatmul.mubr.bf16.vlgmr.msra.gmra.mxu0 %v311_v8 }
  0x99   : > { %719 = vmatmul.mubr.bf16.vlgmr.msra.gmra.mxu1 %v319_v11 }
 0x158   : > { %v679_v17 = vpop.f32.mrf.mxu0 }
 0x159   : > { %v720_v18 = vpop.f32.mrf.mxu1  ;;  %v680_v19 = vadd.f32 %v679_v17, %v289_v15 }
 0x15a   : > { %v681_v20 = vpop.f32.mrf.mxu0 }
 0x15b   : > { %v722_v21 = vpop.f32.mrf.mxu1  ;;  %v682_v22 = vadd.f32 %v681_v20, %v293_v16  ;;  %v721_v25 = vadd.f32 %v720_v18, %v680_v19 }
 0x15c   : > { %v683_v23 = vpop.f32.mrf.mxu0 }
 0x15d   : > { %v724_v24 = vpop.f32.mrf.mxu1  ;;  %v723_v26 = vadd.f32 %v722_v21, %v682_v22 }
 0x15e   : > { %v684_v27 = vpop.f32.mrf.mxu0 }
 0x15f   : > { %v725_v28 = vpop.f32.mrf.mxu1  ;;  %v729_v29 = vcombine.low %v721_v25, %v723_v26 }
 0x161   : > { %925 = vst.sshfl [vmem:[%s213_s17] sm:$0x33 pattern:$0x76325410] %v729_v29 }
 0x162   : > { %1192 = shalt.err (!%p1189_p0)
}
 0x163   : > { %s1193_s10 = scalar_lea.hbm %s752_s22, 64  ;;  %s1197_s30 = scalar_lea.hbm %s1537_s3, 256 }
 0x164   : > { %p1194_p11 = scmp.ne.s32.totalorder %s752_s22, %s1193_s10  ;;  %p1198_p13 = scmp.lt.s32.totalorder %s752_s22, %s1537_s3 }
 0x165   : > { %p1199_p3 = scmp.lt.s32.totalorder %s1197_s30, %s1193_s10 }
 0x166   : > { %p1195_p7 = pnand %p1194_p11, %p1555_p2 }
 0x167   : > { %p1200_p1 = por %p1199_p3, %p1198_p13 }
 0x168   : > { %p1196_p10 = pneg %p1195_p7 }
 0x16a   : > { %p1201_p5 = pnand %p1200_p1, %p1196_p10 }
 0x16c   : > { %1204 = shalt.err (!%p1201_p5)
}
 0x16d   : > { %943 = dma.vmem_to_hbm [thread:$0]  (%p1555_p2), %s755_s19, 64, %s752_s22, %s740_s27  }
 0x16e PF: > { %p965_p8 = scmp.ge.s32.totalorder %s1251_s15, 2  ;;  %s766_s4 = sand.u32 1, %s1239_s12  }
 0x16f   : > { %p1556_p9 = scmp.ne.s32.totalorder %s1545_s25, 0  ;;  %s767_s29 = scalar_lea.sflag [#allocation4], %s766_s4 }
 0x171   : > { %p957_p4 = pnand %p965_p8, %p1556_p9 }
 0x173   : > { %p958_p12 = pneg %p957_p4 }
 0x175   : > { %1234 = dma.done.wait (%p958_p12), %s767_s29, 64  }
 0x176   : > { %1236 = vsyncadd (%p958_p12), %s767_s29, 4294967232  ;;  %p17_p6 = scmp.ge.s32.totalorder %s1305_s18, 6   ;;  %s1557_s12 = smov %s1243_s13 }
 0x177   : > { %s1558_s13 = smov %s1247_s14  ;;  %s1559_s14 = smov %s1317_s21 }
 0x178   : > { %s1560_s15 = smov %s1305_s18  ;;  %19 = sbr.rel (!%p17_p6) target bundleno = 6 (0x6), region = 87 }
 0x17d   :  { %772 = vsyncpa [#allocation3], 1 }
 0x17e   :  { %774 = vsyncpa [#allocation3 + $0x1], 1 }
 0x17f   :  { %775 = vsyncpa [#allocation6], 1 }
 0x180   :  { %777 = vsyncpa [#allocation6 + $0x1], 1 }
 0x181   :  { %778 = vsyncpa [#allocation4], 1 }
 0x182   :  { %780 = vsyncpa [#allocation4 + $0x1], 1 }

</bundles_post_ra>
